<compile_context>
chip_gen: v7x
topology: tpu7x:2x2x1
jax: 0.10.0
libtpu: 0.0.40
codegen_flags: <defaults>
</compile_context>

<pallas_src>
import math
import functools
import jax
import jax.numpy as jnp
from jax import lax
from jax.experimental import pallas as pl
from jax.experimental.pallas import tpu as pltpu


def _round_up(x, m):
    return ((x + m - 1) // m) * m


def sparse_linear_kernel(x_ref, w_ref, b_ref, o_ref, acc_ref):
    """One (tm x tn) output tile of y = x @ w.T + b, accumulated over the K axis."""
    k = pl.program_id(2)

    @pl.when(k == 0)
    def _():
        acc_ref[...] = jnp.zeros_like(acc_ref)

    # Contract the last dim of both tiles: (tm, tk) x (tn, tk) -> (tm, tn).
    # Transposed-RHS feed goes straight to the MXU; no in-kernel w.T (XLU) needed.
    acc_ref[...] += lax.dot_general(
        x_ref[...],
        w_ref[...],
        dimension_numbers=(((1,), (1,)), ((), ())),
        preferred_element_type=jnp.float32,
    )

    @pl.when(k == pl.num_programs(2) - 1)
    def _():
        o_ref[...] = (acc_ref[...] + b_ref[...].astype(jnp.float32)).astype(o_ref.dtype)


@functools.partial(jax.jit, static_argnames=("tm", "tn", "tk"))
def sparse_linear(x, w, b, *, tm=256, tn=256, tk=512):
    """y = x @ w.T + b   (x: (M, K), w: (N, K), b: (N,))."""
    M, K = x.shape
    N, Kw = w.shape
    assert K == Kw, "in_features mismatch"
    out_dtype = x.dtype

    # Clamp tiles to the (padded) problem size, keeping (8, 128) alignment.
    tm = min(tm, _round_up(M, 8))
    tn = min(tn, _round_up(N, 128))
    tk = min(tk, _round_up(K, 128))

    # Pad to tile multiples so arbitrary shapes work with large tiles.
    Mp, Np, Kp = _round_up(M, tm), _round_up(N, tn), _round_up(K, tk)
    if (Mp, Kp) != (M, K):
        x = jnp.pad(x, ((0, Mp - M), (0, Kp - K)))
    if (Np, Kp) != (N, K):
        w = jnp.pad(w, ((0, Np - N), (0, Kp - K)))
    b2 = jnp.pad(b, (0, Np - N)).reshape(1, Np)  # lane-dense bias row

    grid = (Mp // tm, Np // tn, Kp // tk)

    itemsize = jnp.dtype(x.dtype).itemsize
    out_itemsize = jnp.dtype(out_dtype).itemsize
    # Double-buffered input/output tiles + f32 accumulator, with headroom.
    tile_bytes = (
        2 * (tm * tk + tn * tk) * itemsize
        + 2 * tm * tn * out_itemsize
        + tm * tn * 4
        + 2 * tn * jnp.dtype(b.dtype).itemsize
    )
    # Explicit scoped-VMEM budget: fits v7x's 64 MiB physical / 32 MiB default.
    vmem_limit = int(min(32 * 1024 * 1024, max(8 * 1024 * 1024, 2 * tile_bytes)))

    cost = pl.CostEstimate(
        flops=2 * M * N * K,
        transcendentals=0,
        bytes_accessed=(M * K + N * K) * itemsize
        + M * N * out_itemsize
        + N * jnp.dtype(b.dtype).itemsize,
    )

    y_padded = pl.pallas_call(
        sparse_linear_kernel,
        out_shape=jax.ShapeDtypeStruct((Mp, Np), out_dtype),
        grid_spec=pltpu.PrefetchScalarGridSpec(
            num_scalar_prefetch=0,
            grid=grid,
            in_specs=[
                pl.BlockSpec((tm, tk), lambda i, j, k: (i, k)),   # x
                pl.BlockSpec((tn, tk), lambda i, j, k: (j, k)),   # w
                pl.BlockSpec((1, tn), lambda i, j, k: (0, j)),    # bias
            ],
            out_specs=pl.BlockSpec((tm, tn), lambda i, j, k: (i, j)),
            scratch_shapes=[pltpu.VMEM((tm, tn), jnp.float32)],
        ),
        compiler_params=pltpu.CompilerParams(
            dimension_semantics=("parallel", "parallel", "arbitrary"),
            vmem_limit_bytes=vmem_limit,
        ),
        cost_estimate=cost,
    )(x, w, b2)

    return y_padded[:M, :N]


def init_sparse_linear_params(key, in_features, out_features):
    """Deterministic re-implementation of the module's __init__ init scheme."""
    kw, kb = jax.random.split(key)
    # kaiming_uniform_(a=sqrt(5)) on (out, in):
    #   gain = sqrt(2 / (1 + 5)) = sqrt(1/3); bound = gain * sqrt(3 / fan_in)
    w_bound = math.sqrt(1.0 / 3.0) * math.sqrt(3.0 / in_features)
    weight = jax.random.uniform(
        kw, (out_features, in_features), jnp.float32, -w_bound, w_bound
    )
    # bias: uniform(-1/sqrt(fan_in), 1/sqrt(fan_in))
    b_bound = 1.0 / math.sqrt(in_features)
    bias = jax.random.uniform(kb, (out_features,), jnp.float32, -b_bound, b_bound)
    return weight, bias


if __name__ == "__main__":
    key = jax.random.PRNGKey(0)

    # --- small-shape check (exercises clamping + padding path) -------------
    batch, in_features, out_features = 16, 96, 160
    k_param, k_x, k_rest = jax.random.split(key, 3)
    weight, bias = init_sparse_linear_params(k_param, in_features, out_features)
    x = jax.random.normal(k_x, (batch, in_features), jnp.float32)

    y = sparse_linear(x, weight, bias)
    y = jax.block_until_ready(y)
    y_ref = x @ weight.T + bias
    assert y.shape == (batch, out_features)
    assert jnp.allclose(y, y_ref, atol=1e-5, rtol=1e-5)

    # --- larger-shape check (exercises the big-tile multi-step grid) -------
    M2, K2, N2 = 512, 1024, 768
    k_p2, k_x2 = jax.random.split(k_rest)
    w2, b2 = init_sparse_linear_params(k_p2, K2, N2)
    x2 = jax.random.normal(k_x2, (M2, K2), jnp.float32)
    y2 = jax.block_until_ready(sparse_linear(x2, w2, b2))
    y2_ref = x2 @ w2.T + b2
    assert y2.shape == (M2, N2)
    assert jnp.allclose(y2, y2_ref, atol=1e-4, rtol=1e-4)

    print("KERNEL_OK")
</pallas_src>

<mosaic_0001>
module attributes {stable_mosaic.version = 11 : i64} {
  func.func @sparse_linear_kernel(%arg0: i32, %arg1: i32, %arg2: i32, %arg3: memref<16x128xf32, #tpu.memory_space<vmem>>, %arg4: memref<256x128xf32, #tpu.memory_space<vmem>>, %arg5: memref<1x256xf32, #tpu.memory_space<vmem>>, %arg6: memref<16x256xf32, #tpu.memory_space<vmem>>, %arg7: memref<16x256xf32, #tpu.memory_space<vmem>>) attributes {dimension_semantics = [#tpu.dimension_semantics<parallel>, #tpu.dimension_semantics<parallel>, #tpu.dimension_semantics<arbitrary>], iteration_bounds = array<i64: 1, 1, 1>, scalar_prefetch = 0 : i64, scratch_operands = 1 : i64, tpu.core_type = #tpu.core_type<tc>, window_params = [{transform_indices = @transform_0, window_bounds = array<i64: 16, 128>}, {transform_indices = @transform_1, window_bounds = array<i64: 256, 128>}, {transform_indices = @transform_2, window_bounds = array<i64: 1, 256>}, {transform_indices = @transform_3, window_bounds = array<i64: 16, 256>}]} {
    %c0_i32 = arith.constant 0 : i32
    %0 = arith.cmpi eq, %arg2, %c0_i32 : i32
    %1 = arith.extui %0 : i1 to i32
    %c0_i32_0 = arith.constant 0 : i32
    %2 = arith.cmpi ne, %1, %c0_i32_0 : i32
    scf.if %2 {
      %cst_10 = arith.constant 0.000000e+00 : f32
      %12 = vector.broadcast %cst_10 : f32 to vector<16x256xf32>
      %c0_11 = arith.constant 0 : index
      %c0_12 = arith.constant 0 : index
      %13 = vector.load %arg7[%c0_11, %c0_12] : memref<16x256xf32, #tpu.memory_space<vmem>>, vector<16x256xf32>
      tpu.vector_store %arg7[%c0_11, %c0_12], %12 {strides = array<i32>} : memref<16x256xf32, #tpu.memory_space<vmem>>, vector<16x256xf32>,
    } else {
    }
    %c0 = arith.constant 0 : index
    %c0_1 = arith.constant 0 : index
    %3 = vector.load %arg7[%c0, %c0_1] : memref<16x256xf32, #tpu.memory_space<vmem>>, vector<16x256xf32>
    %c0_2 = arith.constant 0 : index
    %c0_3 = arith.constant 0 : index
    %4 = vector.load %arg3[%c0_2, %c0_3] : memref<16x128xf32, #tpu.memory_space<vmem>>, vector<16x128xf32>
    %c0_4 = arith.constant 0 : index
    %c0_5 = arith.constant 0 : index
    %5 = vector.load %arg4[%c0_4, %c0_5] : memref<256x128xf32, #tpu.memory_space<vmem>>, vector<256x128xf32>
    %cst = arith.constant dense<0.000000e+00> : vector<16x256xf32>
    %6 = tpu.matmul %4, %5, %cst {dimension_numbers = #tpu.dot_dimension_numbers<[1], [1], [0], [0], [0, 0, 1, 0], [], []>} : vector<16x128xf32>, vector<256x128xf32>, vector<16x256xf32> -> vector<16x256xf32>
    %7 = arith.addf %3, %6 : vector<16x256xf32>
    %c0_6 = arith.constant 0 : index
    %c0_7 = arith.constant 0 : index
    %8 = vector.load %arg7[%c0_6, %c0_7] : memref<16x256xf32, #tpu.memory_space<vmem>>, vector<16x256xf32>
    tpu.vector_store %arg7[%c0_6, %c0_7], %7 {strides = array<i32>} : memref<16x256xf32, #tpu.memory_space<vmem>>, vector<16x256xf32>,
    %c0_i32_8 = arith.constant 0 : i32
    %9 = arith.cmpi eq, %arg2, %c0_i32_8 : i32
    %10 = arith.extui %9 : i1 to i32
    %c0_i32_9 = arith.constant 0 : i32
    %11 = arith.cmpi ne, %10, %c0_i32_9 : i32
    scf.if %11 {
      %c0_10 = arith.constant 0 : index
      %c0_11 = arith.constant 0 : index
      %12 = vector.load %arg7[%c0_10, %c0_11] : memref<16x256xf32, #tpu.memory_space<vmem>>, vector<16x256xf32>
      %c0_12 = arith.constant 0 : index
      %c0_13 = arith.constant 0 : index
      %13 = vector.load %arg5[%c0_12, %c0_13] : memref<1x256xf32, #tpu.memory_space<vmem>>, vector<1x256xf32>
      %14 = vector.broadcast %13 : vector<1x256xf32> to vector<16x256xf32>
      %15 = arith.addf %12, %14 : vector<16x256xf32>
      %c0_14 = arith.constant 0 : index
      %c0_15 = arith.constant 0 : index
      %16 = vector.load %arg6[%c0_14, %c0_15] : memref<16x256xf32, #tpu.memory_space<vmem>>, vector<16x256xf32>
      tpu.vector_store %arg6[%c0_14, %c0_15], %15 {strides = array<i32>} : memref<16x256xf32, #tpu.memory_space<vmem>>, vector<16x256xf32>,
    } else {
    }
    return
  }
  func.func @transform_0(%arg0: i32, %arg1: i32, %arg2: i32) -> (i32, i32) {
    %c0_i32 = arith.constant 0 : i32
    return %arg0, %arg2 : i32, i32
  }
  func.func @transform_1(%arg0: i32, %arg1: i32, %arg2: i32) -> (i32, i32) {
    %c0_i32 = arith.constant 0 : i32
    return %arg1, %arg2 : i32, i32
  }
  func.func @transform_2(%arg0: i32, %arg1: i32, %arg2: i32) -> (i32, i32) {
    %c0_i32 = arith.constant 0 : i32
    %c0_i32_0 = arith.constant 0 : i32
    return %c0_i32, %arg1 : i32, i32
  }
  func.func @transform_3(%arg0: i32, %arg1: i32, %arg2: i32) -> (i32, i32) {
    %c0_i32 = arith.constant 0 : i32
    return %arg0, %arg1 : i32, i32
  }
}

</mosaic_0001>

<bundles_post_ra>
// kernel: sparse_linear.1
= control target key start
LH: loop header
LB: loop body
LE: loop exit
PB: predicated region body
PF: predicated region fallthrough
CT: control target
= control target key end

     0   :  { %s444_s0 = inlined_call_operand.vmem [shape: f32[16,128], index: 0, kind: input, shape index: {}]   ;;  %s445_s1 = inlined_call_operand.vmem [shape: f32[256,128], index: 1, kind: input, shape index: {}]   ;;  %s446_s2 = inlined_call_operand.vmem [shape: f32[1,256], index: 2, kind: input, shape index: {}]   ;;  %s447_s3 = inlined_call_operand.hbm [shape: f32[16,256], index: 3, kind: output, shape index: {}]  }
   0x1   :  { %v45_v0 = vld [vmem:[%s445_s1 + $0x80] sm:$0xff]  ;;  %v46_v1 = vld [vmem:[%s445_s1 + $0x88] sm:$0xff]  ;;  %v47_v5 = vld [vmem:[%s445_s1 + $0x90] sm:$0xff] }
   0x2   :  { %v29_v2 = vld [vmem:[%s445_s1] sm:$0xff]  ;;  %v225_v3 = vpack.c.bf16 %v46_v1, %v45_v0  ;;  %v30_v4 = vld [vmem:[%s445_s1 + $0x8] sm:$0xff]  ;;  %v48_v6 = vld [vmem:[%s445_s1 + $0x98] sm:$0xff] }
   0x3   :  { %v227_v7 = vpack.c.bf16 %v30_v4, %v29_v2  ;;  %v229_v8 = vpack.c.bf16 %v48_v6, %v47_v5  ;;  %v31_v9 = vld [vmem:[%s445_s1 + $0x10] sm:$0xff]  ;;  %v32_v10 = vld [vmem:[%s445_s1 + $0x18] sm:$0xff]  ;;  %v49_v11 = vld [vmem:[%s445_s1 + $0xa0] sm:$0xff] }
   0x4   :  { %226 = vmatprep.subr.bf16.mxu0 %v225_v3  ;;  %257 = vmatprep.subr.bf16.mxu1 %v225_v3  ;;  %v50_v12 = vld [vmem:[%s445_s1 + $0xa8] sm:$0xff]  ;;  %v231_v13 = vpack.c.bf16 %v32_v10, %v31_v9  ;;  %v356_v15 = vld [vmem:[%s444_s0] sm:$0xff] }
   0x5   :  { %228 = vmatpush3.bf16.xpose.msra.mxu0 %v227_v7  ;;  %265 = vmatpush3.bf16.xpose.msra.mxu1 %v227_v7  ;;  %v233_v14 = vpack.c.bf16 %v50_v12, %v49_v11  ;;  %v28_v16 = vld [vmem:[%s444_s0 + $0x8] sm:$0xff] }
   0x6   :  { %230 = vmatprep.subr.bf16.mxu0 %v229_v8  ;;  %258 = vmatprep.subr.bf16.mxu1 %v229_v8 }
   0x7   :  { %221 = vmatprep.mubr.f32.mxu0 %v356_v15 }
   0x8   :  { %8 = vsyncpa [#allocation4], 0  ;;  %v33_v17 = vld [vmem:[%s445_s1 + $0x20] sm:$0xff]  ;;  %v34_v18 = vld [vmem:[%s445_s1 + $0x28] sm:$0xff]  ;;  %223 = vmatprep.mubr.f32.mxu1 %v28_v16  ;;  %v155_v50 = vlaneseq  ;;  %s300_s26 = smov [#allocation3]  }
   0x9   :  { %v51_v19 = vld [vmem:[%s445_s1 + $0xb0] sm:$0xff]  ;;  %v52_v20 = vld [vmem:[%s445_s1 + $0xb8] sm:$0xff]  ;;  %v235_v21 = vpack.c.bf16 %v34_v18, %v33_v17  ;;  %v53_v25 = vld [vmem:[%s445_s1 + $0xc0] sm:$0xff]  ;;  %s178_s27 = sshll.u32 %s300_s26, 4  ;;  %s179_s27 = int_to_ptr.vmem [resolvable:$true] %s178_s27 }
   0xa   :  { %v237_v22 = vpack.c.bf16 %v52_v20, %v51_v19  ;;  %v35_v23 = vld [vmem:[%s445_s1 + $0x30] sm:$0xff]  ;;  %v36_v24 = vld [vmem:[%s445_s1 + $0x38] sm:$0xff]  ;;  %v54_v26 = vld [vmem:[%s445_s1 + $0xc8] sm:$0xff]  ;;  %v156_v51 = vshrl.u32 %v155_v50, 7  ;;  %p281_p1 = scmp.lt.s32.totalorder %s179_s27, %s179_s27 }
   0xb   :  { %v239_v27 = vpack.c.bf16 %v36_v24, %v35_v23  ;;  %v241_v28 = vpack.c.bf16 %v54_v26, %v53_v25  ;;  %v37_v29 = vld [vmem:[%s445_s1 + $0x40] sm:$0xff]  ;;  %v38_v30 = vld [vmem:[%s445_s1 + $0x48] sm:$0xff]  ;;  %v55_v31 = vld [vmem:[%s445_s1 + $0xd0] sm:$0xff] }
   0xc   :  { %v56_v32 = vld [vmem:[%s445_s1 + $0xd8] sm:$0xff]  ;;  %v243_v33 = vpack.c.bf16 %v38_v30, %v37_v29  ;;  %v39_v35 = vld [vmem:[%s445_s1 + $0x50] sm:$0xff]  ;;  %v57_v37 = vld [vmem:[%s445_s1 + $0xe0] sm:$0xff]  ;;  %v157_v52 = vsub.s32 0, %v156_v51  ;;  %v161_v54 = vsub.s32 1, %v156_v51 }
   0xd   :  { %232 = vmatpush3.bf16.xpose.msra.mxu0 %v231_v13  ;;  %266 = vmatpush3.bf16.xpose.msra.mxu1 %v231_v13  ;;  %v245_v34 = vpack.c.bf16 %v56_v32, %v55_v31  ;;  %v40_v36 = vld [vmem:[%s445_s1 + $0x58] sm:$0xff]  ;;  %v58_v38 = vld [vmem:[%s445_s1 + $0xe8] sm:$0xff]  ;;  %v41_v41 = vld [vmem:[%s445_s1 + $0x60] sm:$0xff] }
   0xe   :  { %234 = vmatprep.subr.bf16.mxu0 %v233_v14  ;;  %259 = vmatprep.subr.bf16.mxu1 %v233_v14  ;;  %v247_v39 = vpack.c.bf16 %v40_v36, %v39_v35  ;;  %v249_v40 = vpack.c.bf16 %v58_v38, %v57_v37  ;;  %v42_v42 = vld [vmem:[%s445_s1 + $0x68] sm:$0xff]  ;;  %v59_v43 = vld [vmem:[%s445_s1 + $0xf0] sm:$0xff]  ;;  %v60_v44 = vld [vmem:[%s445_s1 + $0xf8] sm:$0xff] }
   0xf   :  { %v251_v45 = vpack.c.bf16 %v42_v42, %v41_v41  ;;  %v253_v46 = vpack.c.bf16 %v60_v44, %v59_v43  ;;  %v43_v47 = vld [vmem:[%s445_s1 + $0x70] sm:$0xff]  ;;  %v44_v48 = vld [vmem:[%s445_s1 + $0x78] sm:$0xff]  ;;  %v153_v53 = vld [vmem:[%s446_s2] sm:$0x3]  ;;  %s276_s1 = scalar_lea.vmem %s179_s27, 512 }
  0x10   :  { %v255_v49 = vpack.c.bf16 %v44_v48, %v43_v47  ;;  %v158_v55 = vrot.slane %v153_v53, %v157_v52  ;;  %v162_v56 = vrot.slane %v153_v53, %v161_v54  ;;  %p277_p0 = scmp.ne.s32.totalorder %s179_s27, %s276_s1  ;;  %p282_p2 = scmp.lt.s32.totalorder %s276_s1, %s276_s1 }
  0x12   :  { %p283_p3 = por %p282_p2, %p281_p1 }
  0x14   :  { %p284_p4 = pnand %p283_p3, %p277_p0 }
  0x15   :  { %236 = vmatpush3.bf16.xpose.msra.mxu0 %v235_v21  ;;  %267 = vmatpush3.bf16.xpose.msra.mxu1 %v235_v21 }
  0x16   :  { %238 = vmatprep.subr.bf16.mxu0 %v237_v22  ;;  %260 = vmatprep.subr.bf16.mxu1 %v237_v22 }
  0x1d   :  { %240 = vmatpush3.bf16.xpose.msra.mxu0 %v239_v27  ;;  %268 = vmatpush3.bf16.xpose.msra.mxu1 %v239_v27 }
  0x1e   :  { %242 = vmatprep.subr.bf16.mxu0 %v241_v28  ;;  %261 = vmatprep.subr.bf16.mxu1 %v241_v28 }
  0x25   :  { %244 = vmatpush3.bf16.xpose.msra.mxu0 %v243_v33  ;;  %269 = vmatpush3.bf16.xpose.msra.mxu1 %v243_v33 }
  0x26   :  { %246 = vmatprep.subr.bf16.mxu0 %v245_v34  ;;  %262 = vmatprep.subr.bf16.mxu1 %v245_v34 }
  0x2d   :  { %248 = vmatpush3.bf16.xpose.msra.mxu0 %v247_v39  ;;  %270 = vmatpush3.bf16.xpose.msra.mxu1 %v247_v39 }
  0x2e   :  { %250 = vmatprep.subr.bf16.mxu0 %v249_v40  ;;  %263 = vmatprep.subr.bf16.mxu1 %v249_v40 }
  0x35   :  { %252 = vmatpush3.bf16.xpose.msra.mxu0 %v251_v45  ;;  %271 = vmatpush3.bf16.xpose.msra.mxu1 %v251_v45 }
  0x36   :  { %254 = vmatprep.subr.bf16.mxu0 %v253_v46  ;;  %264 = vmatprep.subr.bf16.mxu1 %v253_v46 }
  0x3d   :  { %256 = vmatpush3.bf16.xpose.msra.mxu0 %v255_v49  ;;  %272 = vmatpush3.bf16.xpose.msra.mxu1 %v255_v49 }
  0x44   :  { %222 = vmatmul.mubr.f32.vlgmr.msra.gmra.mrb[0].mxu0 %v356_v15  ;;  %224 = vmatmul.mubr.f32.vlgmr.msra.gmra.mrb[0].mxu1 %v28_v16 }
 0x117   :  { %v127_v57 = vpop.f32.mrb[0].mxu0  ;;  %v133_v58 = vpop.f32.mrb[0].mxu1 }
 0x118   :  { %v165_v59 = vadd.f32 %v158_v55, %v127_v57  ;;  %v167_v60 = vadd.f32 %v158_v55, %v133_v58  ;;  %v129_v61 = vpop.f32.mrb[1].mxu0  ;;  %v135_v62 = vpop.f32.mrb[1].mxu1 }
 0x119   :  { %v166_v63 = vadd.f32 %v162_v56, %v129_v61  ;;  %v168_v0 = vadd.f32 %v162_v56, %v135_v62 }
 0x11a   :  { %169 = vst [vmem:[#allocation3] sm:$0xff] %v165_v59  ;;  %171 = vst [vmem:[#allocation3 + $0x10] sm:$0xff] %v167_v60 }
 0x11b   :  { %170 = vst [vmem:[#allocation3 + $0x8] sm:$0xff] %v166_v63  ;;  %172 = vst [vmem:[#allocation3 + $0x18] sm:$0xff] %v168_v0 }
 0x11c   :  { %287 = shalt.err (!%p284_p4)
}
 0x11d   :  { %s288_s29 = scalar_lea.hbm %s447_s3, 512 }
 0x11e   :  { %p289_p5 = scmp.ne.s32.totalorder %s447_s3, %s288_s29  ;;  %p292_p6 = scmp.lt.u32.totalorder %s288_s29, %s447_s3 }
 0x120   :  { %p294_p7 = pnand %p292_p6, %p289_p5 }
 0x122   :  { %297 = shalt.err (!%p294_p7)
}
 0x123   :  { %s301_s7 = smov 256   ;;  %s302_s8 = smov 16  }
 0x124   :  { %184 = dma.vmem_to_hbm [thread:$0]  %s179_s27, 512, %s447_s3, [#allocation4], %s301_s7, %s301_s7, %s302_s8  }
 0x125   :  { %298 = dma.done.wait [#allocation4], 512  }
 0x126   :  { %299 = vsyncadd [#allocation4], 4294966784 }
 0x127   :  { %188 = vsyncpa [#allocation4], 1 }

</bundles_post_ra>
